<compile_context>
chip_gen: v7x
topology: tpu7x:2x2x1
jax: 0.10.0
libtpu: 0.0.40
codegen_flags: <defaults>
</compile_context>

<pallas_src>
import jax
import jax.numpy as jnp
from jax import lax
from jax.experimental import pallas as pl
from jax.experimental.pallas import tpu as pltpu

N_ITERS = 5          # module default n_iters=5
INIT_TAU = 0.1       # module default init_tau=0.1
EPS = 1e-8


def _round_up(x, m):
    return ((x + m - 1) // m) * m


def _vmem_budget():
    """Per-generation (block_budget_bytes, vmem_limit_bytes)."""
    cap = 64 * 1024 * 1024                       # conservative fallback (v7x-sized)
    try:
        info = pltpu.get_tpu_info()
        cap = int(getattr(info, "vmem_capacity_bytes", cap) or cap)
    except Exception:
        pass
    vmem_limit = min((cap * 3) // 4, 96 * 1024 * 1024)   # 96 MiB on 128 MiB parts, 48 on v7x
    block_budget = vmem_limit // 6                        # headroom: 2x in-buf + f32 P + temps
    return block_budget, vmem_limit


def _fast_recip(x):
    # EUP approx reciprocal + one Newton step (~1e-7 relative error); only applied to the
    # reduced N-vectors / scalars, never to the full N^2 tensor.
    y = pl.reciprocal(x, approx=True)
    return y * (2.0 - x * y)


# --------------------------------------------------------------- lane-packed path (N < 128)
def _sinkhorn_lanepacked_kernel(tau_ref, s_ref, out_ref):
    # tau_ref: SMEM (1,) f32
    # s_ref  : VMEM (N, N, LB)  -- [row i, col j, batch lane]
    # out_ref: VMEM (N, LB)     -- [col j, batch lane]
    inv_tau = 1.0 / tau_ref[0]                    # hoisted scalar reciprocal
    P = jnp.exp(s_ref[...].astype(jnp.float32) * inv_tau)

    def body(_, P):
        # row normalization: original dim=-1 (cols j) == axis 1
        inv_r = _fast_recip(jnp.sum(P, axis=1, keepdims=True) + EPS)
        P = P * inv_r
        # column normalization: original dim=-2 (rows i) == axis 0 (pure vreg adds)
        inv_c = _fast_recip(jnp.sum(P, axis=0, keepdims=True) + EPS)
        return P * inv_c

    P = lax.fori_loop(0, N_ITERS - 1, body, P, unroll=True)
    # Peeled final iteration: row-normalize, then emit colsum/(colsum+eps) directly
    # (== colsum of the column-normalized P): skips the last N^2 multiply + N^2 reduce
    # and one full rewrite of P.
    inv_r = _fast_recip(jnp.sum(P, axis=1, keepdims=True) + EPS)
    P = P * inv_r
    c = jnp.sum(P, axis=0)                        # (N, LB), lane-dense
    out_ref[...] = (c * _fast_recip(c + EPS)).astype(out_ref.dtype)


def _pick_lanes(B, N, block_budget):
    if B <= 128:
        return B                                  # full-dim lane block, no padding needed
    per_lane = N * N * 4
    lb = max(128, (block_budget // per_lane) // 128 * 128)
    lb = min(lb, _round_up(B, 128))
    # Prefer >=2 grid steps so the "parallel" axis shards across v7x's 2 TensorCores,
    # but only when each half-block is still big enough to amortize per-step overhead.
    if lb >= _round_up(B, 128) and lb > 128 and per_lane * lb >= (1 << 20):
        lb = max(128, _round_up((B + 1) // 2, 128))
    return lb


def _sinkhorn_lanepacked(scores, tau, block_budget, vmem_limit):
    B, N, _ = scores.shape
    LB = _pick_lanes(B, N, block_budget)
    # TODO(synk): fold this [B,N,N]->[N,N,B] relayout into the producer of `scores` (under
    # jit it fuses into the producer's output layout); it is the only wrapper-side HBM copy.
    s_t = jnp.transpose(scores, (1, 2, 0))        # [N, N, B]

    out = pl.pallas_call(
        _sinkhorn_lanepacked_kernel,
        out_shape=jax.ShapeDtypeStruct((N, B), scores.dtype),
        grid=(pl.cdiv(B, LB),),
        in_specs=[
            pl.BlockSpec(memory_space=pltpu.MemorySpace.SMEM),   # tau scalar
            pl.BlockSpec((N, N, LB), lambda b: (0, 0, b)),
        ],
        out_specs=pl.BlockSpec((N, LB), lambda b: (0, b)),
        compiler_params=pltpu.CompilerParams(
            dimension_semantics=("parallel",),
            vmem_limit_bytes=vmem_limit),
    )(tau, s_t)
    return out.T                                  # [B, N] (tiny transpose of the output only)


# --------------------------------------------------------------- batched path (N >= 128)
def _sinkhorn_batched_kernel(tau_ref, s_ref, out_ref):
    # tau_ref: SMEM (1,) f32; s_ref: VMEM (TB, N, N); out_ref: VMEM (TB, 1, N)
    inv_tau = 1.0 / tau_ref[0]
    P = jnp.exp(s_ref[...].astype(jnp.float32) * inv_tau)

    def body(_, P):
        inv_r = _fast_recip(jnp.sum(P, axis=-1, keepdims=True) + EPS)   # N recips, not N^2
        P = P * inv_r
        inv_c = _fast_recip(jnp.sum(P, axis=-2, keepdims=True) + EPS)
        return P * inv_c

    P = lax.fori_loop(0, N_ITERS - 1, body, P, unroll=True)
    # Peeled final iteration (see lane-packed kernel).
    inv_r = _fast_recip(jnp.sum(P, axis=-1, keepdims=True) + EPS)
    P = P * inv_r
    c = jnp.sum(P, axis=-2, keepdims=True)        # (TB, 1, N), lane-dense last dim
    out_ref[...] = (c * _fast_recip(c + EPS)).astype(out_ref.dtype)
    # TODO(synk): reviewer-suggested MXU offload of the two reductions via ones-matmuls is
    # intentionally not applied: a (N,128)-ones row-sum matmul carries a 128x MAC redundancy,
    # so in f32 its MXU time >= the whole VALU iteration it would relieve. Revisit with a
    # narrow block-diagonal ones LHS (TB x TB*N) if large-N throughput becomes critical.


def _pick_tb(B, N, block_budget):
    per_mat = N * N * 4
    # TODO(synk): for per_mat > block_budget (N >~ 1400 on v7x) switch to a row-panel /
    # scaling-vector Sinkhorn (resident r/c vectors) instead of a monolithic (1, N, N) block.
    tb = max(1, block_budget // per_mat)          # no multiple-of-8 floor: (TB,1,N) out block
    tb = min(tb, B)
    # Split into >=2 grid steps for v7x megacore when the single block is large enough.
    if tb >= B and tb > 1 and per_mat * tb >= (1 << 20):
        tb = -(-B // 2)
    return tb


def _sinkhorn_batched(scores, tau, block_budget, vmem_limit):
    B, N, _ = scores.shape
    TB = _pick_tb(B, N, block_budget)

    out = pl.pallas_call(
        _sinkhorn_batched_kernel,
        out_shape=jax.ShapeDtypeStruct((B, 1, N), scores.dtype),
        grid=(pl.cdiv(B, TB),),
        in_specs=[
            pl.BlockSpec(memory_space=pltpu.MemorySpace.SMEM),   # tau scalar
            pl.BlockSpec((TB, N, N), lambda b: (b, 0, 0)),
        ],
        # (TB, 1, N): last two block dims equal the full array dims, so any TB >= 1 is legal.
        out_specs=pl.BlockSpec((TB, 1, N), lambda b: (b, 0, 0)),
        compiler_params=pltpu.CompilerParams(
            dimension_semantics=("parallel",),
            vmem_limit_bytes=vmem_limit),
    )(tau, scores)
    return out.reshape(B, N)


def sinkhorn_sort(scores, tau):
    """scores: [B, N, N], tau: [1] -> [B, N]. Matches TrainableSinkhornSort.forward."""
    _, N, M = scores.shape
    assert N == M, "Sinkhorn expects square score matrices"
    block_budget, vmem_limit = _vmem_budget()
    if N < 128:
        return _sinkhorn_lanepacked(scores, tau, block_budget, vmem_limit)
    return _sinkhorn_batched(scores, tau, block_budget, vmem_limit)


def sinkhorn_sort_ref(scores, tau):
    """Pure-JAX reference mirroring the PyTorch forward exactly."""
    P = jnp.exp(scores / tau[0])
    for _ in range(N_ITERS):
        P = P / (jnp.sum(P, axis=-1, keepdims=True) + EPS)
        P = P / (jnp.sum(P, axis=-2, keepdims=True) + EPS)
    return jnp.sum(P, axis=-2)


if __name__ == "__main__":
    # deterministic parameter init (matches nn.Parameter(torch.tensor(init_tau)))
    tau = jnp.array([INIT_TAU], dtype=jnp.float32)

    # 1) small-N / small-B: lane-packed path with a full-dim (N, N, B) block
    B, N = 2, 8
    scores = jax.random.normal(jax.random.PRNGKey(0), (B, N, N), dtype=jnp.float32)
    out = jax.block_until_ready(sinkhorn_sort(scores, tau))
    ref = sinkhorn_sort_ref(scores, tau)
    assert out.shape == (B, N)
    assert jnp.allclose(out, ref, atol=1e-4, rtol=1e-4), (out, ref)

    # 2) small-N / B not a multiple of 128: exercises the padless partial boundary block
    B1, N1 = 130, 8
    scores1 = jax.random.normal(jax.random.PRNGKey(2), (B1, N1, N1), dtype=jnp.float32)
    out1 = jax.block_until_ready(sinkhorn_sort(scores1, tau))
    ref1 = sinkhorn_sort_ref(scores1, tau)
    assert out1.shape == (B1, N1)
    assert jnp.allclose(out1, ref1, atol=1e-4, rtol=1e-4)

    # 3) larger-N batched path with the (TB, 1, N) lane-dense output block
    B2, N2 = 4, 128
    scores2 = 0.5 * jax.random.normal(jax.random.PRNGKey(1), (B2, N2, N2), dtype=jnp.float32)
    out2 = jax.block_until_ready(sinkhorn_sort(scores2, tau))
    ref2 = sinkhorn_sort_ref(scores2, tau)
    assert out2.shape == (B2, N2)
    assert jnp.allclose(out2, ref2, atol=1e-4, rtol=1e-4)

    print("KERNEL_OK")
</pallas_src>

<mosaic_0001>
module attributes {stable_mosaic.version = 11 : i64} {
  func.func @_sinkhorn_lanepacked_kernel(%arg0: i32, %arg1: memref<1xf32, #tpu.memory_space<smem>>, %arg2: memref<8x8x2xf32, #tpu.memory_space<vmem>>, %arg3: memref<8x2xf32, #tpu.memory_space<vmem>>) attributes {dimension_semantics = [#tpu.dimension_semantics<parallel>], iteration_bounds = array<i64: 1>, scalar_prefetch = 0 : i64, scratch_operands = 0 : i64, tpu.core_type = #tpu.core_type<tc>, window_params = [{transform_indices = @transform_0, window_bounds = array<i64: 1>}, {transform_indices = @transform_1, window_bounds = array<i64: 8, 8, 2>}, {transform_indices = @transform_2, window_bounds = array<i64: 8, 2>}]} {
    %c0 = arith.constant 0 : index
    %0 = memref.load %arg1[%c0] : memref<1xf32, #tpu.memory_space<smem>>
    %cst = arith.constant 1.000000e+00 : f32
    %1 = arith.divf %cst, %0 : f32
    %c0_0 = arith.constant 0 : index
    %c0_1 = arith.constant 0 : index
    %c0_2 = arith.constant 0 : index
    %2 = vector.load %arg2[%c0_0, %c0_1, %c0_2] : memref<8x8x2xf32, #tpu.memory_space<vmem>>, vector<8x8x2xf32>
    %3 = vector.broadcast %1 : f32 to vector<8x8x2xf32>
    %4 = arith.mulf %2, %3 : vector<8x8x2xf32>
    %5 = math.exp %4 : vector<8x8x2xf32>
    %c0_i32 = arith.constant 0 : i32
    %cst_3 = arith.constant dense<0.000000e+00> : vector<8x2xf32>
    %6 = vector.multi_reduction <add>, %5, %cst_3 [1] : vector<8x8x2xf32> to vector<8x2xf32>
    %7 = vector.shape_cast %6 : vector<8x2xf32> to vector<8x1x2xf32>
    %cst_4 = arith.constant 9.99999993E-9 : f32
    %8 = vector.broadcast %cst_4 : f32 to vector<8x1x2xf32>
    %9 = arith.addf %7, %8 : vector<8x1x2xf32>
    %10 = tpu.reciprocal %9 {approx = true} : vector<8x1x2xf32> -> vector<8x1x2xf32>
    %11 = arith.mulf %9, %10 : vector<8x1x2xf32>
    %cst_5 = arith.constant 2.000000e+00 : f32
    %12 = vector.broadcast %cst_5 : f32 to vector<8x1x2xf32>
    %13 = arith.subf %12, %11 : vector<8x1x2xf32>
    %14 = arith.mulf %10, %13 : vector<8x1x2xf32>
    %15 = vector.broadcast %14 : vector<8x1x2xf32> to vector<8x8x2xf32>
    %16 = arith.mulf %5, %15 : vector<8x8x2xf32>
    %cst_6 = arith.constant dense<0.000000e+00> : vector<8x2xf32>
    %17 = vector.multi_reduction <add>, %16, %cst_6 [0] : vector<8x8x2xf32> to vector<8x2xf32>
    %18 = vector.shape_cast %17 : vector<8x2xf32> to vector<1x8x2xf32>
    %cst_7 = arith.constant 9.99999993E-9 : f32
    %19 = vector.broadcast %cst_7 : f32 to vector<1x8x2xf32>
    %20 = arith.addf %18, %19 : vector<1x8x2xf32>
    %21 = tpu.reciprocal %20 {approx = true} : vector<1x8x2xf32> -> vector<1x8x2xf32>
    %22 = arith.mulf %20, %21 : vector<1x8x2xf32>
    %cst_8 = arith.constant 2.000000e+00 : f32
    %23 = vector.broadcast %cst_8 : f32 to vector<1x8x2xf32>
    %24 = arith.subf %23, %22 : vector<1x8x2xf32>
    %25 = arith.mulf %21, %24 : vector<1x8x2xf32>
    %26 = vector.broadcast %25 : vector<1x8x2xf32> to vector<8x8x2xf32>
    %27 = arith.mulf %16, %26 : vector<8x8x2xf32>
    %c1_i32 = arith.constant 1 : i32
    %cst_9 = arith.constant dense<0.000000e+00> : vector<8x2xf32>
    %28 = vector.multi_reduction <add>, %27, %cst_9 [1] : vector<8x8x2xf32> to vector<8x2xf32>
    %29 = vector.shape_cast %28 : vector<8x2xf32> to vector<8x1x2xf32>
    %cst_10 = arith.constant 9.99999993E-9 : f32
    %30 = vector.broadcast %cst_10 : f32 to vector<8x1x2xf32>
    %31 = arith.addf %29, %30 : vector<8x1x2xf32>
    %32 = tpu.reciprocal %31 {approx = true} : vector<8x1x2xf32> -> vector<8x1x2xf32>
    %33 = arith.mulf %31, %32 : vector<8x1x2xf32>
    %cst_11 = arith.constant 2.000000e+00 : f32
    %34 = vector.broadcast %cst_11 : f32 to vector<8x1x2xf32>
    %35 = arith.subf %34, %33 : vector<8x1x2xf32>
    %36 = arith.mulf %32, %35 : vector<8x1x2xf32>
    %37 = vector.broadcast %36 : vector<8x1x2xf32> to vector<8x8x2xf32>
    %38 = arith.mulf %27, %37 : vector<8x8x2xf32>
    %cst_12 = arith.constant dense<0.000000e+00> : vector<8x2xf32>
    %39 = vector.multi_reduction <add>, %38, %cst_12 [0] : vector<8x8x2xf32> to vector<8x2xf32>
    %40 = vector.shape_cast %39 : vector<8x2xf32> to vector<1x8x2xf32>
    %cst_13 = arith.constant 9.99999993E-9 : f32
    %41 = vector.broadcast %cst_13 : f32 to vector<1x8x2xf32>
    %42 = arith.addf %40, %41 : vector<1x8x2xf32>
    %43 = tpu.reciprocal %42 {approx = true} : vector<1x8x2xf32> -> vector<1x8x2xf32>
    %44 = arith.mulf %42, %43 : vector<1x8x2xf32>
    %cst_14 = arith.constant 2.000000e+00 : f32
    %45 = vector.broadcast %cst_14 : f32 to vector<1x8x2xf32>
    %46 = arith.subf %45, %44 : vector<1x8x2xf32>
    %47 = arith.mulf %43, %46 : vector<1x8x2xf32>
    %48 = vector.broadcast %47 : vector<1x8x2xf32> to vector<8x8x2xf32>
    %49 = arith.mulf %38, %48 : vector<8x8x2xf32>
    %c2_i32 = arith.constant 2 : i32
    %cst_15 = arith.constant dense<0.000000e+00> : vector<8x2xf32>
    %50 = vector.multi_reduction <add>, %49, %cst_15 [1] : vector<8x8x2xf32> to vector<8x2xf32>
    %51 = vector.shape_cast %50 : vector<8x2xf32> to vector<8x1x2xf32>
    %cst_16 = arith.constant 9.99999993E-9 : f32
    %52 = vector.broadcast %cst_16 : f32 to vector<8x1x2xf32>
    %53 = arith.addf %51, %52 : vector<8x1x2xf32>
    %54 = tpu.reciprocal %53 {approx = true} : vector<8x1x2xf32> -> vector<8x1x2xf32>
    %55 = arith.mulf %53, %54 : vector<8x1x2xf32>
    %cst_17 = arith.constant 2.000000e+00 : f32
    %56 = vector.broadcast %cst_17 : f32 to vector<8x1x2xf32>
    %57 = arith.subf %56, %55 : vector<8x1x2xf32>
    %58 = arith.mulf %54, %57 : vector<8x1x2xf32>
    %59 = vector.broadcast %58 : vector<8x1x2xf32> to vector<8x8x2xf32>
    %60 = arith.mulf %49, %59 : vector<8x8x2xf32>
    %cst_18 = arith.constant dense<0.000000e+00> : vector<8x2xf32>
    %61 = vector.multi_reduction <add>, %60, %cst_18 [0] : vector<8x8x2xf32> to vector<8x2xf32>
    %62 = vector.shape_cast %61 : vector<8x2xf32> to vector<1x8x2xf32>
    %cst_19 = arith.constant 9.99999993E-9 : f32
    %63 = vector.broadcast %cst_19 : f32 to vector<1x8x2xf32>
    %64 = arith.addf %62, %63 : vector<1x8x2xf32>
    %65 = tpu.reciprocal %64 {approx = true} : vector<1x8x2xf32> -> vector<1x8x2xf32>
    %66 = arith.mulf %64, %65 : vector<1x8x2xf32>
    %cst_20 = arith.constant 2.000000e+00 : f32
    %67 = vector.broadcast %cst_20 : f32 to vector<1x8x2xf32>
    %68 = arith.subf %67, %66 : vector<1x8x2xf32>
    %69 = arith.mulf %65, %68 : vector<1x8x2xf32>
    %70 = vector.broadcast %69 : vector<1x8x2xf32> to vector<8x8x2xf32>
    %71 = arith.mulf %60, %70 : vector<8x8x2xf32>
    %c3_i32 = arith.constant 3 : i32
    %cst_21 = arith.constant dense<0.000000e+00> : vector<8x2xf32>
    %72 = vector.multi_reduction <add>, %71, %cst_21 [1] : vector<8x8x2xf32> to vector<8x2xf32>
    %73 = vector.shape_cast %72 : vector<8x2xf32> to vector<8x1x2xf32>
    %cst_22 = arith.constant 9.99999993E-9 : f32
    %74 = vector.broadcast %cst_22 : f32 to vector<8x1x2xf32>
    %75 = arith.addf %73, %74 : vector<8x1x2xf32>
    %76 = tpu.reciprocal %75 {approx = true} : vector<8x1x2xf32> -> vector<8x1x2xf32>
    %77 = arith.mulf %75, %76 : vector<8x1x2xf32>
    %cst_23 = arith.constant 2.000000e+00 : f32
    %78 = vector.broadcast %cst_23 : f32 to vector<8x1x2xf32>
    %79 = arith.subf %78, %77 : vector<8x1x2xf32>
    %80 = arith.mulf %76, %79 : vector<8x1x2xf32>
    %81 = vector.broadcast %80 : vector<8x1x2xf32> to vector<8x8x2xf32>
    %82 = arith.mulf %71, %81 : vector<8x8x2xf32>
    %cst_24 = arith.constant dense<0.000000e+00> : vector<8x2xf32>
    %83 = vector.multi_reduction <add>, %82, %cst_24 [0] : vector<8x8x2xf32> to vector<8x2xf32>
    %84 = vector.shape_cast %83 : vector<8x2xf32> to vector<1x8x2xf32>
    %cst_25 = arith.constant 9.99999993E-9 : f32
    %85 = vector.broadcast %cst_25 : f32 to vector<1x8x2xf32>
    %86 = arith.addf %84, %85 : vector<1x8x2xf32>
    %87 = tpu.reciprocal %86 {approx = true} : vector<1x8x2xf32> -> vector<1x8x2xf32>
    %88 = arith.mulf %86, %87 : vector<1x8x2xf32>
    %cst_26 = arith.constant 2.000000e+00 : f32
    %89 = vector.broadcast %cst_26 : f32 to vector<1x8x2xf32>
    %90 = arith.subf %89, %88 : vector<1x8x2xf32>
    %91 = arith.mulf %87, %90 : vector<1x8x2xf32>
    %92 = vector.broadcast %91 : vector<1x8x2xf32> to vector<8x8x2xf32>
    %93 = arith.mulf %82, %92 : vector<8x8x2xf32>
    %cst_27 = arith.constant dense<0.000000e+00> : vector<8x2xf32>
    %94 = vector.multi_reduction <add>, %93, %cst_27 [1] : vector<8x8x2xf32> to vector<8x2xf32>
    %95 = vector.shape_cast %94 : vector<8x2xf32> to vector<8x1x2xf32>
    %cst_28 = arith.constant 9.99999993E-9 : f32
    %96 = vector.broadcast %cst_28 : f32 to vector<8x1x2xf32>
    %97 = arith.addf %95, %96 : vector<8x1x2xf32>
    %98 = tpu.reciprocal %97 {approx = true} : vector<8x1x2xf32> -> vector<8x1x2xf32>
    %99 = arith.mulf %97, %98 : vector<8x1x2xf32>
    %cst_29 = arith.constant 2.000000e+00 : f32
    %100 = vector.broadcast %cst_29 : f32 to vector<8x1x2xf32>
    %101 = arith.subf %100, %99 : vector<8x1x2xf32>
    %102 = arith.mulf %98, %101 : vector<8x1x2xf32>
    %103 = vector.broadcast %102 : vector<8x1x2xf32> to vector<8x8x2xf32>
    %104 = arith.mulf %93, %103 : vector<8x8x2xf32>
    %cst_30 = arith.constant dense<0.000000e+00> : vector<8x2xf32>
    %105 = vector.multi_reduction <add>, %104, %cst_30 [0] : vector<8x8x2xf32> to vector<8x2xf32>
    %cst_31 = arith.constant 9.99999993E-9 : f32
    %106 = vector.broadcast %cst_31 : f32 to vector<8x2xf32>
    %107 = arith.addf %105, %106 : vector<8x2xf32>
    %108 = tpu.reciprocal %107 {approx = true} : vector<8x2xf32> -> vector<8x2xf32>
    %109 = arith.mulf %107, %108 : vector<8x2xf32>
    %cst_32 = arith.constant 2.000000e+00 : f32
    %110 = vector.broadcast %cst_32 : f32 to vector<8x2xf32>
    %111 = arith.subf %110, %109 : vector<8x2xf32>
    %112 = arith.mulf %108, %111 : vector<8x2xf32>
    %113 = arith.mulf %105, %112 : vector<8x2xf32>
    %c0_33 = arith.constant 0 : index
    %c0_34 = arith.constant 0 : index
    %114 = vector.load %arg3[%c0_33, %c0_34] : memref<8x2xf32, #tpu.memory_space<vmem>>, vector<8x2xf32>
    tpu.vector_store %arg3[%c0_33, %c0_34], %113 {strides = array<i32>} : memref<8x2xf32, #tpu.memory_space<vmem>>, vector<8x2xf32>,
    return
  }
  func.func @transform_0(%arg0: i32) -> i32 {
    %c0_i32 = arith.constant 0 : i32
    %c0_i32_0 = arith.constant 0 : i32
    return %c0_i32 : i32
  }
  func.func @transform_1(%arg0: i32) -> (i32, i32, i32) {
    %c0_i32 = arith.constant 0 : i32
    %c0_i32_0 = arith.constant 0 : i32
    %c0_i32_1 = arith.constant 0 : i32
    return %c0_i32, %c0_i32_0, %arg0 : i32, i32, i32
  }
  func.func @transform_2(%arg0: i32) -> (i32, i32) {
    %c0_i32 = arith.constant 0 : i32
    %c0_i32_0 = arith.constant 0 : i32
    return %c0_i32, %arg0 : i32, i32
  }
}

</mosaic_0001>

<bundles_post_ra>
// kernel: tpu_custom_call.1
= control target key start
LH: loop header
LB: loop body
LE: loop exit
PB: predicated region body
PF: predicated region fallthrough
CT: control target
= control target key end

     0   :  { %vm49_vm0 = vcmask 15360   ;;  %s1104_s0 = inlined_call_operand.<no memory space> [shape: f32[1], index: 0, kind: input, shape index: {}]   ;;  %s1105_s1 = inlined_call_operand.vmem [shape: f32[8,8,2], index: 1, kind: input, shape index: {}]   ;;  %s1106_s2 = inlined_call_operand.vmem [shape: f32[8,2], index: 2, kind: output, shape index: {}]  }
   0x1   :  { %v13_v0 = vstv %s1104_s0  ;;  %v16_v2 = vld [vmem:[%s1105_s1] sm:$0xff]  ;;  %v17_v3 = vld [vmem:[%s1105_s1 + $0x8] sm:$0xff]  ;;  %v18_v4 = vld [vmem:[%s1105_s1 + $0x10] sm:$0xff] }
   0x2   :  { %710 = vrcp.f32 %v13_v0  ;;  %v19_v5 = vld [vmem:[%s1105_s1 + $0x18] sm:$0xff]  ;;  %v20_v6 = vld [vmem:[%s1105_s1 + $0x20] sm:$0xff]  ;;  %v21_v7 = vld [vmem:[%s1105_s1 + $0x28] sm:$0xff] }
   0x3   :  { %v22_v8 = vld [vmem:[%s1105_s1 + $0x30] sm:$0xff]  ;;  %v23_v10 = vld [vmem:[%s1105_s1 + $0x38] sm:$0xff] }
   0xc   :  { %v711_v1 = vpop.eup %710 }
   0xd   :  { %708 = vpush %v711_v1 }
  0x3e   :  { %s709_s0 = spop %708 }
  0x3f   :  { %v24_v9 = vstv %s709_s0 }
  0x40   :  { %v25_v11 = vmul.f32 %v24_v9, %v16_v2  ;;  %v26_v12 = vmul.f32 %v24_v9, %v17_v3  ;;  %v27_v13 = vmul.f32 %v24_v9, %v18_v4  ;;  %v28_v14 = vmul.f32 %v24_v9, %v19_v5 }
  0x41   :  { %v29_v15 = vmul.f32 %v24_v9, %v20_v6  ;;  %v30_v16 = vmul.f32 %v24_v9, %v21_v7  ;;  %v31_v17 = vmul.f32 %v24_v9, %v22_v8  ;;  %v32_v21 = vmul.f32 %v24_v9, %v23_v10 }
  0x42   :  { %v33_v18 = vmul.f32 1.442695, %v25_v11  ;;  %v35_v19 = vmul.f32 1.442695, %v26_v12  ;;  %v37_v20 = vmul.f32 1.442695, %v27_v13 }
  0x43   :  { %v39_v22 = vmul.f32 1.442695, %v28_v14  ;;  %v41_v23 = vmul.f32 1.442695, %v29_v15  ;;  %v43_v24 = vmul.f32 1.442695, %v30_v16 }
  0x44   :  { %712 = vpow2.f32 %v33_v18  ;;  %v45_v25 = vmul.f32 1.442695, %v31_v17  ;;  %v47_v26 = vmul.f32 1.442695, %v32_v21 }
  0x45   :  { %714 = vpow2.f32 %v35_v19 }
  0x46   :  { %716 = vpow2.f32 %v37_v20 }
  0x47   :  { %718 = vpow2.f32 %v39_v22 }
  0x48   :  { %720 = vpow2.f32 %v41_v23 }
  0x49   :  { %722 = vpow2.f32 %v43_v24 }
  0x4a   :  { %724 = vpow2.f32 %v45_v25 }
  0x4b   :  { %726 = vpow2.f32 %v47_v26 }
  0x4e   :  { %v860_v27 = vpop.eup %712 }
  0x4f   :  { %v862_v28 = vpop.eup %714  ;;  %v50_v29 = vsel %vm49_vm0, %v860_v27, 0.0 }
  0x50   :  { %v866_v30 = vpop.eup %716  ;;  %v51_v31 = vrot.slane %v50_v29, 4  ;;  %v57_v32 = vsel %vm49_vm0, %v862_v28, 0.0 }
  0x51   :  { %v870_v33 = vpop.eup %718  ;;  %v58_v34 = vrot.slane %v57_v32, 4  ;;  %v64_v35 = vsel %vm49_vm0, %v866_v30, 0.0 }
  0x52   :  { %v874_v36 = vpop.eup %720  ;;  %v52_v37 = vadd.f32 %v51_v31, %v50_v29  ;;  %v65_v38 = vrot.slane %v64_v35, 4  ;;  %v71_v39 = vsel %vm49_vm0, %v870_v33, 0.0 }
  0x53   :  { %v878_v40 = vpop.eup %722  ;;  %v59_v41 = vadd.f32 %v58_v34, %v57_v32  ;;  %v72_v42 = vrot.slane %v71_v39, 4  ;;  %v78_v43 = vsel %vm49_vm0, %v874_v36, 0.0 }
  0x54   :  { %v882_v44 = vpop.eup %724  ;;  %v53_v45 = vrot.slane %v52_v37, 2  ;;  %v66_v46 = vadd.f32 %v65_v38, %v64_v35  ;;  %v79_v47 = vrot.slane %v78_v43, 4  ;;  %v85_v48 = vsel %vm49_vm0, %v878_v40, 0.0 }
  0x55   :  { %v886_v49 = vpop.eup %726  ;;  %v60_v50 = vrot.slane %v59_v41, 2  ;;  %v73_v51 = vadd.f32 %v72_v42, %v71_v39  ;;  %v86_v52 = vrot.slane %v85_v48, 4  ;;  %v92_v53 = vsel %vm49_vm0, %v882_v44, 0.0 }
  0x56   :  { %v54_v54 = vadd.f32 %v53_v45, %v52_v37  ;;  %v67_v55 = vrot.slane %v66_v46, 2  ;;  %v80_v56 = vadd.f32 %v79_v47, %v78_v43  ;;  %v93_v57 = vrot.slane %v92_v53, 4 }
  0x57   :  { %v61_v58 = vadd.f32 %v60_v50, %v59_v41  ;;  %v74_v59 = vrot.slane %v73_v51, 2  ;;  %v87_v60 = vadd.f32 %v86_v52, %v85_v48  ;;  %v99_v61 = vsel %vm49_vm0, %v886_v49, 0.0 }
  0x58   :  { %v55_v62 = vrot.slane %v54_v54, 1  ;;  %v68_v63 = vadd.f32 %v67_v55, %v66_v46  ;;  %v81_v0 = vrot.slane %v80_v56, 2  ;;  %v94_v1 = vadd.f32 %v93_v57, %v92_v53 }
  0x59   :  { %v62_v2 = vrot.slane %v61_v58, 1  ;;  %v75_v3 = vadd.f32 %v74_v59, %v73_v51  ;;  %v88_v4 = vrot.slane %v87_v60, 2  ;;  %v100_v5 = vrot.slane %v99_v61, 4 }
  0x5a   :  { %v56_v6 = vadd.f32 %v55_v62, %v54_v54  ;;  %v69_v7 = vrot.slane %v68_v63, 1  ;;  %v82_v8 = vadd.f32 %v81_v0, %v80_v56  ;;  %v95_v9 = vrot.slane %v94_v1, 2 }
  0x5b   :  { %v63_v10 = vadd.f32 %v62_v2, %v61_v58  ;;  %v76_v11 = vrot.slane %v75_v3, 1  ;;  %v89_v12 = vadd.f32 %v88_v4, %v87_v60  ;;  %v101_v13 = vadd.f32 %v100_v5, %v99_v61 }
  0x5c   :  { %v70_v14 = vadd.f32 %v69_v7, %v68_v63  ;;  %v83_v15 = vrot.slane %v82_v8, 1  ;;  %v96_v16 = vadd.f32 %v95_v9, %v94_v1  ;;  %v106_v17 = vadd.f32 1e-08, %v56_v6 }
  0x5d   :  { %v77_v18 = vadd.f32 %v76_v11, %v75_v3  ;;  %v90_v19 = vrot.slane %v89_v12, 1  ;;  %v102_v20 = vrot.slane %v101_v13, 2  ;;  %v107_v21 = vadd.f32 1e-08, %v63_v10 }
  0x5e   :  { %v84_v22 = vadd.f32 %v83_v15, %v82_v8  ;;  %v97_v23 = vrot.slane %v96_v16, 1  ;;  %v108_v24 = vadd.f32 1e-08, %v70_v14  ;;  %728 = vrcp.f32 %v106_v17 }
  0x5f   :  { %v91_v25 = vadd.f32 %v90_v19, %v89_v12  ;;  %v103_v26 = vadd.f32 %v102_v20, %v101_v13  ;;  %v109_v29 = vadd.f32 1e-08, %v77_v18  ;;  %730 = vrcp.f32 %v107_v21 }
  0x60   :  { %v98_v31 = vadd.f32 %v97_v23, %v96_v16  ;;  %v110_v32 = vadd.f32 1e-08, %v84_v22  ;;  %732 = vrcp.f32 %v108_v24 }
  0x61   :  { %v104_v34 = vrot.slane %v103_v26, 1  ;;  %v111_v35 = vadd.f32 1e-08, %v91_v25  ;;  %734 = vrcp.f32 %v109_v29 }
  0x62   :  { %v112_v37 = vadd.f32 1e-08, %v98_v31  ;;  %736 = vrcp.f32 %v110_v32 }
  0x63   :  { %v105_v38 = vadd.f32 %v104_v34, %v103_v26  ;;  %738 = vrcp.f32 %v111_v35 }
  0x64   :  { %740 = vrcp.f32 %v112_v37 }
  0x65   :  { %v113_v39 = vadd.f32 1e-08, %v105_v38 }
  0x67   :  { %742 = vrcp.f32 %v113_v39 }
  0x68   :  { %v729_v41 = vpop.eup %728 }
  0x69   :  { %v731_v42 = vpop.eup %730  ;;  %v122_v43 = vmul.f32 %v729_v41, %v106_v17 }
  0x6a   :  { %v733_v45 = vpop.eup %732  ;;  %v123_v46 = vmul.f32 %v731_v42, %v107_v21 }
  0x6b   :  { %v735_v47 = vpop.eup %734  ;;  %v124_v48 = vmul.f32 %v733_v45, %v108_v24  ;;  %v130_v50 = vsub.f32 2.0, %v122_v43 }
  0x6c   :  { %v737_v51 = vpop.eup %736  ;;  %v125_v52 = vmul.f32 %v735_v47, %v109_v29  ;;  %v131_v53 = vsub.f32 2.0, %v123_v46 }
  0x6d   :  { %v739_v54 = vpop.eup %738  ;;  %v126_v55 = vmul.f32 %v737_v51, %v110_v32  ;;  %v132_v56 = vsub.f32 2.0, %v124_v48  ;;  %v138_v57 = vmul.f32 %v729_v41, %v130_v50 }
  0x6e   :  { %v741_v58 = vpop.eup %740  ;;  %v127_v59 = vmul.f32 %v739_v54, %v111_v35  ;;  %v133_v60 = vsub.f32 2.0, %v125_v52  ;;  %v139_v61 = vmul.f32 %v731_v42, %v131_v53 }
  0x6f   :  { %v128_v62 = vmul.f32 %v741_v58, %v112_v37  ;;  %v134_v63 = vsub.f32 2.0, %v126_v55  ;;  %v140_v0 = vmul.f32 %v733_v45, %v132_v56  ;;  %v146_v1 = vmul.f32 %v860_v27, %v138_v57 }
  0x70   :  { %v135_v2 = vsub.f32 2.0, %v127_v59  ;;  %v141_v3 = vmul.f32 %v735_v47, %v133_v60  ;;  %v147_v4 = vmul.f32 %v862_v28, %v139_v61 }
  0x71   :  { %v743_v5 = vpop.eup %742  ;;  %v136_v6 = vsub.f32 2.0, %v128_v62  ;;  %v142_v7 = vmul.f32 %v737_v51, %v134_v63  ;;  %v148_v8 = vmul.f32 %v866_v30, %v140_v0  ;;  %v154_v9 = vsel %vm49_vm0, %v146_v1, 0.0 }
  0x72   :  { %v129_v10 = vmul.f32 %v743_v5, %v113_v39  ;;  %v143_v11 = vmul.f32 %v739_v54, %v135_v2  ;;  %v149_v12 = vmul.f32 %v870_v33, %v141_v3  ;;  %v155_v13 = vsel %vm49_vm0, %v147_v4, 0.0 }
  0x73   :  { %v156_v14 = vadd.f32 %v155_v13, %v154_v9  ;;  %v144_v27 = vmul.f32 %v741_v58, %v136_v6  ;;  %v150_v16 = vmul.f32 %v874_v36, %v142_v7  ;;  %v157_v28 = vsel %vm49_vm0, %v148_v8, 0.0 }
  0x74   :  { %v137_v15 = vsub.f32 2.0, %v129_v10  ;;  %v151_v19 = vmul.f32 %v878_v40, %v143_v11  ;;  %v159_v30 = vsel %vm49_vm0, %v149_v12, 0.0 }
  0x75   :  { %v158_v17 = vadd.f32 %v157_v28, %v156_v14  ;;  %v152_v21 = vmul.f32 %v882_v44, %v144_v27  ;;  %v161_v33 = vsel %vm49_vm0, %v150_v16, 0.0 }
  0x76   :  { %v145_v18 = vmul.f32 %v743_v5, %v137_v15  ;;  %v163_v24 = vsel %vm49_vm0, %v151_v19, 0.0 }
  0x77   :  { %v160_v20 = vadd.f32 %v159_v30, %v158_v17  ;;  %v165_v36 = vsel %vm49_vm0, %v152_v21, 0.0 }
  0x78   :  { %v153_v23 = vmul.f32 %v886_v49, %v145_v18 }
  0x79   :  { %v162_v22 = vadd.f32 %v161_v33, %v160_v20 }
  0x7a   :  { %v167_v29 = vsel %vm49_vm0, %v153_v23, 0.0 }
  0x7b   :  { %v164_v25 = vadd.f32 %v163_v24, %v162_v22 }
  0x7d   :  { %v166_v26 = vadd.f32 %v165_v36, %v164_v25 }
  0x7f   :  { %v168_v31 = vadd.f32 %v167_v29, %v166_v26 }
  0x81   :  { %v169_v40 = vadd.f32 1e-08, %v168_v31 }
  0x83   :  { %744 = vrcp.f32 %v169_v40 }
  0x8d   :  { %v745_v32 = vpop.eup %744 }
  0x8e   :  { %v171_v34 = vmul.f32 %v745_v32, %v169_v40 }
  0x90   :  { %v172_v35 = vsub.f32 2.0, %v171_v34 }
  0x92   :  { %v173_v44 = vmul.f32 %v745_v32, %v172_v35 }
  0x94   :  { %v908_v37 = vmul.f32 %v173_v44, %v146_v1  ;;  %v910_v38 = vmul.f32 %v173_v44, %v147_v4  ;;  %v912_v49 = vmul.f32 %v173_v44, %v148_v8  ;;  %v914_v39 = vmul.f32 %v173_v44, %v149_v12 }
  0x95   :  { %v916_v41 = vmul.f32 %v173_v44, %v150_v16  ;;  %v918_v42 = vmul.f32 %v173_v44, %v151_v19  ;;  %v920_v43 = vmul.f32 %v173_v44, %v152_v21  ;;  %v922_v45 = vmul.f32 %v173_v44, %v153_v23 }
  0x96   :  { %v182_v46 = vsel %vm49_vm0, %v908_v37, 0.0  ;;  %v189_v47 = vsel %vm49_vm0, %v910_v38, 0.0  ;;  %v196_v48 = vsel %vm49_vm0, %v912_v49, 0.0  ;;  %v203_v50 = vsel %vm49_vm0, %v914_v39, 0.0 }
  0x97   :  { %v183_v51 = vrot.slane %v182_v46, 4  ;;  %v190_v52 = vrot.slane %v189_v47, 4  ;;  %v197_v53 = vrot.slane %v196_v48, 4  ;;  %v204_v54 = vrot.slane %v203_v50, 4 }
  0x98   :  { %v210_v55 = vsel %vm49_vm0, %v916_v41, 0.0  ;;  %v217_v56 = vsel %vm49_vm0, %v918_v42, 0.0  ;;  %v224_v57 = vsel %vm49_vm0, %v920_v43, 0.0  ;;  %v231_v58 = vsel %vm49_vm0, %v922_v45, 0.0 }
  0x99   :  { %v184_v59 = vadd.f32 %v183_v51, %v182_v46  ;;  %v191_v60 = vadd.f32 %v190_v52, %v189_v47  ;;  %v198_v61 = vadd.f32 %v197_v53, %v196_v48  ;;  %v205_v62 = vadd.f32 %v204_v54, %v203_v50 }
  0x9a   :  { %v211_v63 = vrot.slane %v210_v55, 4  ;;  %v218_v0 = vrot.slane %v217_v56, 4  ;;  %v225_v1 = vrot.slane %v224_v57, 4  ;;  %v232_v2 = vrot.slane %v231_v58, 4 }
  0x9b   :  { %v185_v3 = vrot.slane %v184_v59, 2  ;;  %v192_v4 = vrot.slane %v191_v60, 2  ;;  %v199_v5 = vrot.slane %v198_v61, 2  ;;  %v206_v6 = vrot.slane %v205_v62, 2 }
  0x9c   :  { %v212_v7 = vadd.f32 %v211_v63, %v210_v55  ;;  %v219_v8 = vadd.f32 %v218_v0, %v217_v56  ;;  %v226_v9 = vadd.f32 %v225_v1, %v224_v57  ;;  %v233_v10 = vadd.f32 %v232_v2, %v231_v58 }
  0x9d   :  { %v186_v11 = vadd.f32 %v185_v3, %v184_v59  ;;  %v193_v12 = vadd.f32 %v192_v4, %v191_v60  ;;  %v200_v13 = vadd.f32 %v199_v5, %v198_v61  ;;  %v207_v14 = vadd.f32 %v206_v6, %v205_v62 }
  0x9e   :  { %v213_v15 = vrot.slane %v212_v7, 2  ;;  %v220_v27 = vrot.slane %v219_v8, 2  ;;  %v227_v16 = vrot.slane %v226_v9, 2  ;;  %v234_v28 = vrot.slane %v233_v10, 2 }
  0x9f   :  { %v187_v17 = vrot.slane %v186_v11, 1  ;;  %v194_v18 = vrot.slane %v193_v12, 1  ;;  %v201_v19 = vrot.slane %v200_v13, 1  ;;  %v208_v30 = vrot.slane %v207_v14, 1 }
  0xa0   :  { %v214_v20 = vadd.f32 %v213_v15, %v212_v7  ;;  %v221_v21 = vadd.f32 %v220_v27, %v219_v8  ;;  %v228_v33 = vadd.f32 %v227_v16, %v226_v9  ;;  %v235_v22 = vadd.f32 %v234_v28, %v233_v10 }
  0xa1   :  { %v188_v23 = vadd.f32 %v187_v17, %v186_v11  ;;  %v195_v24 = vadd.f32 %v194_v18, %v193_v12  ;;  %v202_v25 = vadd.f32 %v201_v19, %v200_v13  ;;  %v209_v36 = vadd.f32 %v208_v30, %v207_v14 }
  0xa2   :  { %v215_v26 = vrot.slane %v214_v20, 1  ;;  %v222_v29 = vrot.slane %v221_v21, 1  ;;  %v229_v31 = vrot.slane %v228_v33, 1  ;;  %v236_v40 = vrot.slane %v235_v22, 1 }
  0xa3   :  { %v238_v32 = vadd.f32 1e-08, %v188_v23  ;;  %v239_v34 = vadd.f32 1e-08, %v195_v24  ;;  %v240_v35 = vadd.f32 1e-08, %v202_v25 }
  0xa4   :  { %v216_v44 = vadd.f32 %v215_v26, %v214_v20  ;;  %v223_v46 = vadd.f32 %v222_v29, %v221_v21  ;;  %v230_v47 = vadd.f32 %v229_v31, %v228_v33  ;;  %v237_v48 = vadd.f32 %v236_v40, %v235_v22 }
  0xa5   :  { %v241_v50 = vadd.f32 1e-08, %v209_v36  ;;  %746 = vrcp.f32 %v238_v32 }
  0xa6   :  { %v242_v51 = vadd.f32 1e-08, %v216_v44  ;;  %v243_v52 = vadd.f32 1e-08, %v223_v46  ;;  %748 = vrcp.f32 %v239_v34  ;;  %v244_v53 = vadd.f32 1e-08, %v230_v47 }
  0xa7   :  { %750 = vrcp.f32 %v240_v35  ;;  %v245_v54 = vadd.f32 1e-08, %v237_v48 }
  0xa8   :  { %752 = vrcp.f32 %v241_v50 }
  0xa9   :  { %754 = vrcp.f32 %v242_v51 }
  0xaa   :  { %756 = vrcp.f32 %v243_v52 }
  0xab   :  { %758 = vrcp.f32 %v244_v53 }
  0xac   :  { %760 = vrcp.f32 %v245_v54 }
  0xaf   :  { %v747_v55 = vpop.eup %746 }
  0xb0   :  { %v749_v56 = vpop.eup %748  ;;  %v254_v57 = vmul.f32 %v747_v55, %v238_v32 }
  0xb1   :  { %v751_v58 = vpop.eup %750  ;;  %v255_v59 = vmul.f32 %v749_v56, %v239_v34 }
  0xb2   :  { %v753_v60 = vpop.eup %752  ;;  %v256_v61 = vmul.f32 %v751_v58, %v240_v35  ;;  %v262_v62 = vsub.f32 2.0, %v254_v57 }
  0xb3   :  { %v755_v63 = vpop.eup %754  ;;  %v257_v0 = vmul.f32 %v753_v60, %v241_v50  ;;  %v263_v1 = vsub.f32 2.0, %v255_v59 }
  0xb4   :  { %v757_v2 = vpop.eup %756  ;;  %v258_v3 = vmul.f32 %v755_v63, %v242_v51  ;;  %v264_v4 = vsub.f32 2.0, %v256_v61  ;;  %v270_v5 = vmul.f32 %v747_v55, %v262_v62 }
  0xb5   :  { %v759_v6 = vpop.eup %758  ;;  %v259_v7 = vmul.f32 %v757_v2, %v243_v52  ;;  %v265_v8 = vsub.f32 2.0, %v257_v0  ;;  %v271_v9 = vmul.f32 %v749_v56, %v263_v1 }
  0xb6   :  { %v761_v10 = vpop.eup %760  ;;  %v260_v11 = vmul.f32 %v759_v6, %v244_v53  ;;  %v266_v12 = vsub.f32 2.0, %v258_v3  ;;  %v272_v13 = vmul.f32 %v751_v58, %v264_v4  ;;  %v278_v14 = vmul.f32 %v270_v5, %v908_v37 }
  0xb7   :  { %v261_v15 = vmul.f32 %v761_v10, %v245_v54  ;;  %v267_v27 = vsub.f32 2.0, %v259_v7  ;;  %v273_v16 = vmul.f32 %v753_v60, %v265_v8  ;;  %v279_v28 = vmul.f32 %v271_v9, %v910_v38 }
  0xb8   :  { %v268_v17 = vsub.f32 2.0, %v260_v11  ;;  %v274_v18 = vmul.f32 %v755_v63, %v266_v12  ;;  %v280_v19 = vmul.f32 %v272_v13, %v912_v49  ;;  %v286_v30 = vsel %vm49_vm0, %v278_v14, 0.0 }
  0xb9   :  { %v269_v20 = vsub.f32 2.0, %v261_v15  ;;  %v275_v21 = vmul.f32 %v757_v2, %v267_v27  ;;  %v281_v33 = vmul.f32 %v273_v16, %v914_v39  ;;  %v287_v22 = vsel %vm49_vm0, %v279_v28, 0.0 }
  0xba   :  { %v288_v23 = vadd.f32 %v287_v22, %v286_v30  ;;  %v276_v24 = vmul.f32 %v759_v6, %v268_v17  ;;  %v282_v37 = vmul.f32 %v274_v18, %v916_v41  ;;  %v289_v25 = vsel %vm49_vm0, %v280_v19, 0.0 }
  0xbb   :  { %v277_v38 = vmul.f32 %v761_v10, %v269_v20  ;;  %v283_v26 = vmul.f32 %v275_v21, %v918_v42  ;;  %v291_v49 = vsel %vm49_vm0, %v281_v33, 0.0 }
  0xbc   :  { %v290_v36 = vadd.f32 %v289_v25, %v288_v23  ;;  %v284_v31 = vmul.f32 %v276_v24, %v920_v43  ;;  %v293_v40 = vsel %vm49_vm0, %v282_v37, 0.0 }
  0xbd   :  { %v285_v32 = vmul.f32 %v277_v38, %v922_v45  ;;  %v295_v34 = vsel %vm49_vm0, %v283_v26, 0.0 }
  0xbe   :  { %v292_v29 = vadd.f32 %v291_v49, %v290_v36  ;;  %v297_v41 = vsel %vm49_vm0, %v284_v31, 0.0 }
  0xbf   :  { %v299_v46 = vsel %vm49_vm0, %v285_v32, 0.0 }
  0xc0   :  { %v294_v39 = vadd.f32 %v293_v40, %v292_v29 }
  0xc2   :  { %v296_v35 = vadd.f32 %v295_v34, %v294_v39 }
  0xc4   :  { %v298_v44 = vadd.f32 %v297_v41, %v296_v35 }
  0xc6   :  { %v300_v47 = vadd.f32 %v299_v46, %v298_v44 }
  0xc8   :  { %v301_v42 = vadd.f32 1e-08, %v300_v47 }
  0xca   :  { %762 = vrcp.f32 %v301_v42 }
  0xd4   :  { %v763_v48 = vpop.eup %762 }
  0xd5   :  { %v303_v50 = vmul.f32 %v763_v48, %v301_v42 }
  0xd7   :  { %v304_v51 = vsub.f32 2.0, %v303_v50 }
  0xd9   :  { %v305_v43 = vmul.f32 %v763_v48, %v304_v51 }
  0xdb   :  { %v956_v52 = vmul.f32 %v305_v43, %v278_v14  ;;  %v958_v53 = vmul.f32 %v305_v43, %v279_v28  ;;  %v960_v45 = vmul.f32 %v305_v43, %v280_v19  ;;  %v962_v54 = vmul.f32 %v305_v43, %v281_v33 }
  0xdc   :  { %v964_v55 = vmul.f32 %v305_v43, %v282_v37  ;;  %v966_v56 = vmul.f32 %v305_v43, %v283_v26  ;;  %v968_v57 = vmul.f32 %v305_v43, %v284_v31  ;;  %v970_v58 = vmul.f32 %v305_v43, %v285_v32 }
  0xdd   :  { %v314_v59 = vsel %vm49_vm0, %v956_v52, 0.0  ;;  %v321_v60 = vsel %vm49_vm0, %v958_v53, 0.0  ;;  %v328_v61 = vsel %vm49_vm0, %v960_v45, 0.0  ;;  %v335_v62 = vsel %vm49_vm0, %v962_v54, 0.0 }
  0xde   :  { %v315_v63 = vrot.slane %v314_v59, 4  ;;  %v322_v0 = vrot.slane %v321_v60, 4  ;;  %v329_v1 = vrot.slane %v328_v61, 4  ;;  %v336_v2 = vrot.slane %v335_v62, 4 }
  0xdf   :  { %v342_v3 = vsel %vm49_vm0, %v964_v55, 0.0  ;;  %v349_v4 = vsel %vm49_vm0, %v966_v56, 0.0  ;;  %v356_v5 = vsel %vm49_vm0, %v968_v57, 0.0  ;;  %v363_v6 = vsel %vm49_vm0, %v970_v58, 0.0 }
  0xe0   :  { %v316_v7 = vadd.f32 %v315_v63, %v314_v59  ;;  %v323_v8 = vadd.f32 %v322_v0, %v321_v60  ;;  %v330_v9 = vadd.f32 %v329_v1, %v328_v61  ;;  %v337_v10 = vadd.f32 %v336_v2, %v335_v62 }
  0xe1   :  { %v343_v11 = vrot.slane %v342_v3, 4  ;;  %v350_v12 = vrot.slane %v349_v4, 4  ;;  %v357_v13 = vrot.slane %v356_v5, 4  ;;  %v364_v14 = vrot.slane %v363_v6, 4 }
  0xe2   :  { %v317_v15 = vrot.slane %v316_v7, 2  ;;  %v324_v27 = vrot.slane %v323_v8, 2  ;;  %v331_v16 = vrot.slane %v330_v9, 2  ;;  %v338_v28 = vrot.slane %v337_v10, 2 }
  0xe3   :  { %v344_v17 = vadd.f32 %v343_v11, %v342_v3  ;;  %v351_v18 = vadd.f32 %v350_v12, %v349_v4  ;;  %v358_v19 = vadd.f32 %v357_v13, %v356_v5  ;;  %v365_v30 = vadd.f32 %v364_v14, %v363_v6 }
  0xe4   :  { %v318_v20 = vadd.f32 %v317_v15, %v316_v7  ;;  %v325_v21 = vadd.f32 %v324_v27, %v323_v8  ;;  %v332_v33 = vadd.f32 %v331_v16, %v330_v9  ;;  %v339_v22 = vadd.f32 %v338_v28, %v337_v10 }
  0xe5   :  { %v345_v23 = vrot.slane %v344_v17, 2  ;;  %v352_v24 = vrot.slane %v351_v18, 2  ;;  %v359_v37 = vrot.slane %v358_v19, 2  ;;  %v366_v25 = vrot.slane %v365_v30, 2 }
  0xe6   :  { %v319_v36 = vrot.slane %v318_v20, 1  ;;  %v326_v38 = vrot.slane %v325_v21, 1  ;;  %v333_v26 = vrot.slane %v332_v33, 1  ;;  %v340_v49 = vrot.slane %v339_v22, 1 }
  0xe7   :  { %v346_v29 = vadd.f32 %v345_v23, %v344_v17  ;;  %v353_v31 = vadd.f32 %v352_v24, %v351_v18  ;;  %v360_v40 = vadd.f32 %v359_v37, %v358_v19  ;;  %v367_v39 = vadd.f32 %v366_v25, %v365_v30 }
  0xe8   :  { %v320_v32 = vadd.f32 %v319_v36, %v318_v20  ;;  %v327_v34 = vadd.f32 %v326_v38, %v325_v21  ;;  %v334_v35 = vadd.f32 %v333_v26, %v332_v33  ;;  %v341_v41 = vadd.f32 %v340_v49, %v339_v22 }
  0xe9   :  { %v347_v44 = vrot.slane %v346_v29, 1  ;;  %v354_v46 = vrot.slane %v353_v31, 1  ;;  %v361_v47 = vrot.slane %v360_v40, 1  ;;  %v368_v42 = vrot.slane %v367_v39, 1 }
  0xea   :  { %v370_v48 = vadd.f32 1e-08, %v320_v32  ;;  %v371_v50 = vadd.f32 1e-08, %v327_v34  ;;  %v372_v51 = vadd.f32 1e-08, %v334_v35 }
  0xeb   :  { %v348_v43 = vadd.f32 %v347_v44, %v346_v29  ;;  %v355_v59 = vadd.f32 %v354_v46, %v353_v31  ;;  %v362_v60 = vadd.f32 %v361_v47, %v360_v40  ;;  %v369_v61 = vadd.f32 %v368_v42, %v367_v39 }
  0xec   :  { %v373_v62 = vadd.f32 1e-08, %v341_v41  ;;  %764 = vrcp.f32 %v370_v48 }
  0xed   :  { %v374_v63 = vadd.f32 1e-08, %v348_v43  ;;  %v375_v0 = vadd.f32 1e-08, %v355_v59  ;;  %766 = vrcp.f32 %v371_v50  ;;  %v376_v1 = vadd.f32 1e-08, %v362_v60 }
  0xee   :  { %768 = vrcp.f32 %v372_v51  ;;  %v377_v2 = vadd.f32 1e-08, %v369_v61 }
  0xef   :  { %770 = vrcp.f32 %v373_v62 }
  0xf0   :  { %772 = vrcp.f32 %v374_v63 }
  0xf1   :  { %774 = vrcp.f32 %v375_v0 }
  0xf2   :  { %776 = vrcp.f32 %v376_v1 }
  0xf3   :  { %778 = vrcp.f32 %v377_v2 }
  0xf6   :  { %v765_v3 = vpop.eup %764 }
  0xf7   :  { %v767_v4 = vpop.eup %766  ;;  %v386_v5 = vmul.f32 %v765_v3, %v370_v48 }
  0xf8   :  { %v769_v6 = vpop.eup %768  ;;  %v387_v7 = vmul.f32 %v767_v4, %v371_v50 }
  0xf9   :  { %v771_v8 = vpop.eup %770  ;;  %v388_v9 = vmul.f32 %v769_v6, %v372_v51  ;;  %v394_v10 = vsub.f32 2.0, %v386_v5 }
  0xfa   :  { %v773_v11 = vpop.eup %772  ;;  %v389_v12 = vmul.f32 %v771_v8, %v373_v62  ;;  %v395_v13 = vsub.f32 2.0, %v387_v7 }
  0xfb   :  { %v775_v14 = vpop.eup %774  ;;  %v390_v15 = vmul.f32 %v773_v11, %v374_v63  ;;  %v396_v27 = vsub.f32 2.0, %v388_v9  ;;  %v402_v16 = vmul.f32 %v765_v3, %v394_v10 }
  0xfc   :  { %v777_v28 = vpop.eup %776  ;;  %v391_v17 = vmul.f32 %v775_v14, %v375_v0  ;;  %v397_v18 = vsub.f32 2.0, %v389_v12  ;;  %v403_v19 = vmul.f32 %v767_v4, %v395_v13 }
  0xfd   :  { %v779_v30 = vpop.eup %778  ;;  %v392_v20 = vmul.f32 %v777_v28, %v376_v1  ;;  %v398_v21 = vsub.f32 2.0, %v390_v15  ;;  %v404_v33 = vmul.f32 %v769_v6, %v396_v27  ;;  %v410_v22 = vmul.f32 %v402_v16, %v956_v52 }
  0xfe   :  { %v393_v23 = vmul.f32 %v779_v30, %v377_v2  ;;  %v399_v24 = vsub.f32 2.0, %v391_v17  ;;  %v405_v37 = vmul.f32 %v771_v8, %v397_v18  ;;  %v411_v25 = vmul.f32 %v403_v19, %v958_v53 }
  0xff   :  { %v400_v36 = vsub.f32 2.0, %v392_v20  ;;  %v406_v38 = vmul.f32 %v773_v11, %v398_v21  ;;  %v412_v26 = vmul.f32 %v404_v33, %v960_v45  ;;  %v418_v49 = vsel %vm49_vm0, %v410_v22, 0.0 }
 0x100   :  { %v401_v29 = vsub.f32 2.0, %v393_v23  ;;  %v407_v31 = vmul.f32 %v775_v14, %v399_v24  ;;  %v413_v40 = vmul.f32 %v405_v37, %v962_v54  ;;  %v419_v39 = vsel %vm49_vm0, %v411_v25, 0.0 }
 0x101   :  { %v420_v32 = vadd.f32 %v419_v39, %v418_v49  ;;  %v408_v34 = vmul.f32 %v777_v28, %v400_v36  ;;  %v414_v52 = vmul.f32 %v406_v38, %v964_v55  ;;  %v421_v35 = vsel %vm49_vm0, %v412_v26, 0.0 }
 0x102   :  { %v409_v53 = vmul.f32 %v779_v30, %v401_v29  ;;  %v415_v44 = vmul.f32 %v407_v31, %v966_v56  ;;  %v423_v45 = vsel %vm49_vm0, %v413_v40, 0.0 }
 0x103   :  { %v422_v41 = vadd.f32 %v421_v35, %v420_v32  ;;  %v416_v47 = vmul.f32 %v408_v34, %v968_v57  ;;  %v425_v42 = vsel %vm49_vm0, %v414_v52, 0.0 }
 0x104   :  { %v417_v48 = vmul.f32 %v409_v53, %v970_v58  ;;  %v427_v50 = vsel %vm49_vm0, %v415_v44, 0.0 }
 0x105   :  { %v424_v46 = vadd.f32 %v423_v45, %v422_v41  ;;  %v429_v55 = vsel %vm49_vm0, %v416_v47, 0.0 }
 0x106   :  { %v431_v59 = vsel %vm49_vm0, %v417_v48, 0.0 }
 0x107   :  { %v426_v54 = vadd.f32 %v425_v42, %v424_v46 }
 0x109   :  { %v428_v51 = vadd.f32 %v427_v50, %v426_v54 }
 0x10b   :  { %v430_v43 = vadd.f32 %v429_v55, %v428_v51 }
 0x10d   :  { %v432_v60 = vadd.f32 %v431_v59, %v430_v43 }
 0x10f   :  { %v433_v56 = vadd.f32 1e-08, %v432_v60 }
 0x111   :  { %780 = vrcp.f32 %v433_v56 }
 0x11b   :  { %v781_v61 = vpop.eup %780 }
 0x11c   :  { %v435_v62 = vmul.f32 %v781_v61, %v433_v56 }
 0x11e   :  { %v436_v63 = vsub.f32 2.0, %v435_v62 }
 0x120   :  { %v437_v57 = vmul.f32 %v781_v61, %v436_v63 }
 0x122   :  { %v1004_v0 = vmul.f32 %v437_v57, %v410_v22  ;;  %v1006_v1 = vmul.f32 %v437_v57, %v411_v25  ;;  %v1008_v58 = vmul.f32 %v437_v57, %v412_v26  ;;  %v1010_v2 = vmul.f32 %v437_v57, %v413_v40 }
 0x123   :  { %v1012_v3 = vmul.f32 %v437_v57, %v414_v52  ;;  %v1014_v4 = vmul.f32 %v437_v57, %v415_v44  ;;  %v1016_v5 = vmul.f32 %v437_v57, %v416_v47  ;;  %v1018_v6 = vmul.f32 %v437_v57, %v417_v48 }
 0x124   :  { %v446_v7 = vsel %vm49_vm0, %v1004_v0, 0.0  ;;  %v453_v8 = vsel %vm49_vm0, %v1006_v1, 0.0  ;;  %v460_v9 = vsel %vm49_vm0, %v1008_v58, 0.0  ;;  %v467_v10 = vsel %vm49_vm0, %v1010_v2, 0.0 }
 0x125   :  { %v447_v11 = vrot.slane %v446_v7, 4  ;;  %v454_v12 = vrot.slane %v453_v8, 4  ;;  %v461_v13 = vrot.slane %v460_v9, 4  ;;  %v468_v14 = vrot.slane %v467_v10, 4 }
 0x126   :  { %v474_v15 = vsel %vm49_vm0, %v1012_v3, 0.0  ;;  %v481_v27 = vsel %vm49_vm0, %v1014_v4, 0.0  ;;  %v488_v16 = vsel %vm49_vm0, %v1016_v5, 0.0  ;;  %v495_v28 = vsel %vm49_vm0, %v1018_v6, 0.0 }
 0x127   :  { %v448_v17 = vadd.f32 %v447_v11, %v446_v7  ;;  %v455_v18 = vadd.f32 %v454_v12, %v453_v8  ;;  %v462_v19 = vadd.f32 %v461_v13, %v460_v9  ;;  %v469_v30 = vadd.f32 %v468_v14, %v467_v10 }
 0x128   :  { %v475_v20 = vrot.slane %v474_v15, 4  ;;  %v482_v21 = vrot.slane %v481_v27, 4  ;;  %v489_v33 = vrot.slane %v488_v16, 4  ;;  %v496_v22 = vrot.slane %v495_v28, 4 }
 0x129   :  { %v449_v23 = vrot.slane %v448_v17, 2  ;;  %v456_v24 = vrot.slane %v455_v18, 2  ;;  %v463_v37 = vrot.slane %v462_v19, 2  ;;  %v470_v25 = vrot.slane %v469_v30, 2 }
 0x12a   :  { %v476_v36 = vadd.f32 %v475_v20, %v474_v15  ;;  %v483_v38 = vadd.f32 %v482_v21, %v481_v27  ;;  %v490_v26 = vadd.f32 %v489_v33, %v488_v16  ;;  %v497_v49 = vadd.f32 %v496_v22, %v495_v28 }
 0x12b   :  { %v450_v29 = vadd.f32 %v449_v23, %v448_v17  ;;  %v457_v31 = vadd.f32 %v456_v24, %v455_v18  ;;  %v464_v40 = vadd.f32 %v463_v37, %v462_v19  ;;  %v471_v39 = vadd.f32 %v470_v25, %v469_v30 }
 0x12c   :  { %v477_v32 = vrot.slane %v476_v36, 2  ;;  %v484_v34 = vrot.slane %v483_v38, 2  ;;  %v491_v52 = vrot.slane %v490_v26, 2  ;;  %v498_v35 = vrot.slane %v497_v49, 2 }
 0x12d   :  { %v451_v41 = vrot.slane %v450_v29, 1  ;;  %v458_v53 = vrot.slane %v457_v31, 1  ;;  %v465_v44 = vrot.slane %v464_v40, 1  ;;  %v472_v45 = vrot.slane %v471_v39, 1 }
 0x12e   :  { %v478_v46 = vadd.f32 %v477_v32, %v476_v36  ;;  %v485_v47 = vadd.f32 %v484_v34, %v483_v38  ;;  %v492_v42 = vadd.f32 %v491_v52, %v490_v26  ;;  %v499_v54 = vadd.f32 %v498_v35, %v497_v49 }
 0x12f   :  { %v452_v48 = vadd.f32 %v451_v41, %v450_v29  ;;  %v459_v50 = vadd.f32 %v458_v53, %v457_v31  ;;  %v466_v51 = vadd.f32 %v465_v44, %v464_v40  ;;  %v473_v55 = vadd.f32 %v472_v45, %v471_v39 }
 0x130   :  { %v479_v43 = vrot.slane %v478_v46, 1  ;;  %v486_v59 = vrot.slane %v485_v47, 1  ;;  %v493_v60 = vrot.slane %v492_v42, 1  ;;  %v500_v56 = vrot.slane %v499_v54, 1 }
 0x131   :  { %v502_v61 = vadd.f32 1e-08, %v452_v48  ;;  %v503_v62 = vadd.f32 1e-08, %v459_v50  ;;  %v504_v63 = vadd.f32 1e-08, %v466_v51 }
 0x132   :  { %v480_v57 = vadd.f32 %v479_v43, %v478_v46  ;;  %v487_v7 = vadd.f32 %v486_v59, %v485_v47  ;;  %v494_v8 = vadd.f32 %v493_v60, %v492_v42  ;;  %v501_v9 = vadd.f32 %v500_v56, %v499_v54 }
 0x133   :  { %v505_v10 = vadd.f32 1e-08, %v473_v55  ;;  %782 = vrcp.f32 %v502_v61 }
 0x134   :  { %v506_v11 = vadd.f32 1e-08, %v480_v57  ;;  %v507_v12 = vadd.f32 1e-08, %v487_v7  ;;  %784 = vrcp.f32 %v503_v62  ;;  %v508_v13 = vadd.f32 1e-08, %v494_v8 }
 0x135   :  { %786 = vrcp.f32 %v504_v63  ;;  %v509_v14 = vadd.f32 1e-08, %v501_v9 }
 0x136   :  { %788 = vrcp.f32 %v505_v10 }
 0x137   :  { %790 = vrcp.f32 %v506_v11 }
 0x138   :  { %792 = vrcp.f32 %v507_v12 }
 0x139   :  { %794 = vrcp.f32 %v508_v13 }
 0x13a   :  { %796 = vrcp.f32 %v509_v14 }
 0x13d   :  { %v783_v15 = vpop.eup %782 }
 0x13e   :  { %v785_v27 = vpop.eup %784  ;;  %v518_v16 = vmul.f32 %v783_v15, %v502_v61 }
 0x13f   :  { %v787_v28 = vpop.eup %786  ;;  %v519_v17 = vmul.f32 %v785_v27, %v503_v62 }
 0x140   :  { %v789_v18 = vpop.eup %788  ;;  %v520_v19 = vmul.f32 %v787_v28, %v504_v63  ;;  %v526_v30 = vsub.f32 2.0, %v518_v16 }
 0x141   :  { %v791_v20 = vpop.eup %790  ;;  %v521_v21 = vmul.f32 %v789_v18, %v505_v10  ;;  %v527_v33 = vsub.f32 2.0, %v519_v17 }
 0x142   :  { %v793_v22 = vpop.eup %792  ;;  %v522_v23 = vmul.f32 %v791_v20, %v506_v11  ;;  %v528_v24 = vsub.f32 2.0, %v520_v19  ;;  %v534_v37 = vmul.f32 %v783_v15, %v526_v30 }
 0x143   :  { %v795_v25 = vpop.eup %794  ;;  %v523_v36 = vmul.f32 %v793_v22, %v507_v12  ;;  %v529_v38 = vsub.f32 2.0, %v521_v21  ;;  %v535_v26 = vmul.f32 %v785_v27, %v527_v33 }
 0x144   :  { %v797_v49 = vpop.eup %796  ;;  %v524_v29 = vmul.f32 %v795_v25, %v508_v13  ;;  %v530_v31 = vsub.f32 2.0, %v522_v23  ;;  %v536_v40 = vmul.f32 %v787_v28, %v528_v24  ;;  %v542_v39 = vmul.f32 %v534_v37, %v1004_v0 }
 0x145   :  { %v525_v32 = vmul.f32 %v797_v49, %v509_v14  ;;  %v531_v34 = vsub.f32 2.0, %v523_v36  ;;  %v537_v52 = vmul.f32 %v789_v18, %v529_v38  ;;  %v543_v35 = vmul.f32 %v535_v26, %v1006_v1 }
 0x146   :  { %v532_v41 = vsub.f32 2.0, %v524_v29  ;;  %v538_v53 = vmul.f32 %v791_v20, %v530_v31  ;;  %v544_v44 = vmul.f32 %v536_v40, %v1008_v58  ;;  %v550_v45 = vsel %vm49_vm0, %v542_v39, 0.0 }
 0x147   :  { %v533_v46 = vsub.f32 2.0, %v525_v32  ;;  %v539_v47 = vmul.f32 %v793_v22, %v531_v34  ;;  %v545_v42 = vmul.f32 %v537_v52, %v1010_v2  ;;  %v551_v54 = vsel %vm49_vm0, %v543_v35, 0.0 }
 0x148   :  { %v552_v48 = vadd.f32 %v551_v54, %v550_v45  ;;  %v540_v50 = vmul.f32 %v795_v25, %v532_v41  ;;  %v546_v0 = vmul.f32 %v538_v53, %v1012_v3  ;;  %v553_v51 = vsel %vm49_vm0, %v544_v44, 0.0 }
 0x149   :  { %v541_v1 = vmul.f32 %v797_v49, %v533_v46  ;;  %v547_v43 = vmul.f32 %v539_v47, %v1014_v4  ;;  %v555_v58 = vsel %vm49_vm0, %v545_v42, 0.0 }
 0x14a   :  { %v554_v55 = vadd.f32 %v553_v51, %v552_v48  ;;  %v548_v60 = vmul.f32 %v540_v50, %v1016_v5  ;;  %v557_v56 = vsel %vm49_vm0, %v546_v0, 0.0 }
 0x14b   :  { %v549_v61 = vmul.f32 %v541_v1, %v1018_v6  ;;  %v559_v62 = vsel %vm49_vm0, %v547_v43, 0.0 }
 0x14c   :  { %v556_v59 = vadd.f32 %v555_v58, %v554_v55  ;;  %v561_v3 = vsel %vm49_vm0, %v548_v60, 0.0 }
 0x14d   :  { %v563_v7 = vsel %vm49_vm0, %v549_v61, 0.0 }
 0x14e   :  { %v558_v2 = vadd.f32 %v557_v56, %v556_v59 }
 0x150   :  { %v560_v63 = vadd.f32 %v559_v62, %v558_v2 }
 0x152   :  { %v562_v57 = vadd.f32 %v561_v3, %v560_v63 }
 0x154   :  { %v564_v8 = vadd.f32 %v563_v7, %v562_v57 }
 0x156   :  { %v565_v4 = vadd.f32 1e-08, %v564_v8 }
 0x158   :  { %798 = vrcp.f32 %v565_v4 }
 0x162   :  { %v799_v9 = vpop.eup %798 }
 0x163   :  { %v567_v10 = vmul.f32 %v799_v9, %v565_v4 }
 0x165   :  { %v568_v11 = vsub.f32 2.0, %v567_v10 }
 0x167   :  { %v569_v5 = vmul.f32 %v799_v9, %v568_v11 }
 0x169   :  { %v1052_v12 = vmul.f32 %v569_v5, %v542_v39  ;;  %v1054_v13 = vmul.f32 %v569_v5, %v543_v35  ;;  %v1056_v6 = vmul.f32 %v569_v5, %v544_v44  ;;  %v1058_v14 = vmul.f32 %v569_v5, %v545_v42 }
 0x16a   :  { %v1060_v15 = vmul.f32 %v569_v5, %v546_v0  ;;  %v1062_v27 = vmul.f32 %v569_v5, %v547_v43  ;;  %v1064_v16 = vmul.f32 %v569_v5, %v548_v60  ;;  %v1066_v28 = vmul.f32 %v569_v5, %v549_v61 }
 0x16b   :  { %v578_v17 = vsel %vm49_vm0, %v1052_v12, 0.0  ;;  %v585_v18 = vsel %vm49_vm0, %v1054_v13, 0.0  ;;  %v592_v19 = vsel %vm49_vm0, %v1056_v6, 0.0  ;;  %v599_v30 = vsel %vm49_vm0, %v1058_v14, 0.0 }
 0x16c   :  { %v579_v20 = vrot.slane %v578_v17, 4  ;;  %v586_v21 = vrot.slane %v585_v18, 4  ;;  %v593_v33 = vrot.slane %v592_v19, 4  ;;  %v600_v22 = vrot.slane %v599_v30, 4 }
 0x16d   :  { %v606_v23 = vsel %vm49_vm0, %v1060_v15, 0.0  ;;  %v613_v24 = vsel %vm49_vm0, %v1062_v27, 0.0  ;;  %v620_v37 = vsel %vm49_vm0, %v1064_v16, 0.0  ;;  %v627_v25 = vsel %vm49_vm0, %v1066_v28, 0.0 }
 0x16e   :  { %v580_v36 = vadd.f32 %v579_v20, %v578_v17  ;;  %v587_v38 = vadd.f32 %v586_v21, %v585_v18  ;;  %v594_v26 = vadd.f32 %v593_v33, %v592_v19  ;;  %v601_v49 = vadd.f32 %v600_v22, %v599_v30 }
 0x16f   :  { %v607_v29 = vrot.slane %v606_v23, 4  ;;  %v614_v31 = vrot.slane %v613_v24, 4  ;;  %v621_v40 = vrot.slane %v620_v37, 4  ;;  %v628_v39 = vrot.slane %v627_v25, 4 }
 0x170   :  { %v581_v32 = vrot.slane %v580_v36, 2  ;;  %v588_v34 = vrot.slane %v587_v38, 2  ;;  %v595_v52 = vrot.slane %v594_v26, 2  ;;  %v602_v35 = vrot.slane %v601_v49, 2 }
 0x171   :  { %v608_v41 = vadd.f32 %v607_v29, %v606_v23  ;;  %v615_v53 = vadd.f32 %v614_v31, %v613_v24  ;;  %v622_v44 = vadd.f32 %v621_v40, %v620_v37  ;;  %v629_v45 = vadd.f32 %v628_v39, %v627_v25 }
 0x172   :  { %v582_v46 = vadd.f32 %v581_v32, %v580_v36  ;;  %v589_v47 = vadd.f32 %v588_v34, %v587_v38  ;;  %v596_v42 = vadd.f32 %v595_v52, %v594_v26  ;;  %v603_v54 = vadd.f32 %v602_v35, %v601_v49 }
 0x173   :  { %v609_v48 = vrot.slane %v608_v41, 2  ;;  %v616_v50 = vrot.slane %v615_v53, 2  ;;  %v623_v0 = vrot.slane %v622_v44, 2  ;;  %v630_v51 = vrot.slane %v629_v45, 2 }
 0x174   :  { %v583_v55 = vrot.slane %v582_v46, 1  ;;  %v590_v1 = vrot.slane %v589_v47, 1  ;;  %v597_v43 = vrot.slane %v596_v42, 1  ;;  %v604_v58 = vrot.slane %v603_v54, 1 }
 0x175   :  { %v610_v59 = vadd.f32 %v609_v48, %v608_v41  ;;  %v617_v60 = vadd.f32 %v616_v50, %v615_v53  ;;  %v624_v56 = vadd.f32 %v623_v0, %v622_v44  ;;  %v631_v2 = vadd.f32 %v630_v51, %v629_v45 }
 0x176   :  { %v584_v61 = vadd.f32 %v583_v55, %v582_v46  ;;  %v591_v62 = vadd.f32 %v590_v1, %v589_v47  ;;  %v598_v63 = vadd.f32 %v597_v43, %v596_v42  ;;  %v605_v3 = vadd.f32 %v604_v58, %v603_v54 }
 0x177   :  { %v611_v57 = vrot.slane %v610_v59, 1  ;;  %v618_v7 = vrot.slane %v617_v60, 1  ;;  %v625_v8 = vrot.slane %v624_v56, 1  ;;  %v632_v4 = vrot.slane %v631_v2, 1 }
 0x178   :  { %v634_v9 = vadd.f32 1e-08, %v584_v61  ;;  %v635_v10 = vadd.f32 1e-08, %v591_v62  ;;  %v636_v11 = vadd.f32 1e-08, %v598_v63 }
 0x179   :  { %v612_v5 = vadd.f32 %v611_v57, %v610_v59  ;;  %v619_v17 = vadd.f32 %v618_v7, %v617_v60  ;;  %v626_v18 = vadd.f32 %v625_v8, %v624_v56  ;;  %v633_v19 = vadd.f32 %v632_v4, %v631_v2 }
 0x17a   :  { %v637_v30 = vadd.f32 1e-08, %v605_v3  ;;  %800 = vrcp.f32 %v634_v9 }
 0x17b   :  { %v638_v20 = vadd.f32 1e-08, %v612_v5  ;;  %v639_v21 = vadd.f32 1e-08, %v619_v17  ;;  %802 = vrcp.f32 %v635_v10  ;;  %v640_v33 = vadd.f32 1e-08, %v626_v18 }
 0x17c   :  { %804 = vrcp.f32 %v636_v11  ;;  %v641_v22 = vadd.f32 1e-08, %v633_v19 }
 0x17d   :  { %806 = vrcp.f32 %v637_v30 }
 0x17e   :  { %808 = vrcp.f32 %v638_v20 }
 0x17f   :  { %810 = vrcp.f32 %v639_v21 }
 0x180   :  { %812 = vrcp.f32 %v640_v33 }
 0x181   :  { %814 = vrcp.f32 %v641_v22 }
 0x184   :  { %v801_v23 = vpop.eup %800 }
 0x185   :  { %v803_v24 = vpop.eup %802  ;;  %v650_v37 = vmul.f32 %v801_v23, %v634_v9 }
 0x186   :  { %v805_v25 = vpop.eup %804  ;;  %v651_v36 = vmul.f32 %v803_v24, %v635_v10 }
 0x187   :  { %v807_v38 = vpop.eup %806  ;;  %v652_v26 = vmul.f32 %v805_v25, %v636_v11  ;;  %v658_v49 = vsub.f32 2.0, %v650_v37 }
 0x188   :  { %v809_v29 = vpop.eup %808  ;;  %v653_v31 = vmul.f32 %v807_v38, %v637_v30  ;;  %v659_v40 = vsub.f32 2.0, %v651_v36 }
 0x189   :  { %v811_v39 = vpop.eup %810  ;;  %v654_v32 = vmul.f32 %v809_v29, %v638_v20  ;;  %v660_v34 = vsub.f32 2.0, %v652_v26  ;;  %v666_v52 = vmul.f32 %v801_v23, %v658_v49 }
 0x18a   :  { %v813_v35 = vpop.eup %812  ;;  %v655_v41 = vmul.f32 %v811_v39, %v639_v21  ;;  %v661_v53 = vsub.f32 2.0, %v653_v31  ;;  %v667_v44 = vmul.f32 %v803_v24, %v659_v40 }
 0x18b   :  { %v815_v45 = vpop.eup %814  ;;  %v656_v46 = vmul.f32 %v813_v35, %v640_v33  ;;  %v662_v47 = vsub.f32 2.0, %v654_v32  ;;  %v668_v42 = vmul.f32 %v805_v25, %v660_v34  ;;  %v674_v54 = vmul.f32 %v666_v52, %v1052_v12 }
 0x18c   :  { %v657_v48 = vmul.f32 %v815_v45, %v641_v22  ;;  %v663_v50 = vsub.f32 2.0, %v655_v41  ;;  %v669_v0 = vmul.f32 %v807_v38, %v661_v53  ;;  %v675_v51 = vmul.f32 %v667_v44, %v1054_v13 }
 0x18d   :  { %v664_v55 = vsub.f32 2.0, %v656_v46  ;;  %v670_v1 = vmul.f32 %v809_v29, %v662_v47  ;;  %v676_v43 = vmul.f32 %v668_v42, %v1056_v6  ;;  %v682_v58 = vsel %vm49_vm0, %v674_v54, 0.0 }
 0x18e   :  { %v665_v59 = vsub.f32 2.0, %v657_v48  ;;  %v671_v60 = vmul.f32 %v811_v39, %v663_v50  ;;  %v677_v56 = vmul.f32 %v669_v0, %v1058_v14  ;;  %v683_v2 = vsel %vm49_vm0, %v675_v51, 0.0 }
 0x18f   :  { %v684_v61 = vadd.f32 %v683_v2, %v682_v58  ;;  %v672_v62 = vmul.f32 %v813_v35, %v664_v55  ;;  %v678_v12 = vmul.f32 %v670_v1, %v1060_v15  ;;  %v685_v63 = vsel %vm49_vm0, %v676_v43, 0.0 }
 0x190   :  { %v673_v13 = vmul.f32 %v815_v45, %v665_v59  ;;  %v679_v57 = vmul.f32 %v671_v60, %v1062_v27  ;;  %v687_v6 = vsel %vm49_vm0, %v677_v56, 0.0 }
 0x191   :  { %v686_v3 = vadd.f32 %v685_v63, %v684_v61  ;;  %v680_v8 = vmul.f32 %v672_v62, %v1064_v16  ;;  %v689_v4 = vsel %vm49_vm0, %v678_v12, 0.0 }
 0x192   :  { %v681_v9 = vmul.f32 %v673_v13, %v1066_v28  ;;  %v691_v10 = vsel %vm49_vm0, %v679_v57, 0.0 }
 0x193   :  { %v688_v7 = vadd.f32 %v687_v6, %v686_v3  ;;  %v693_v15 = vsel %vm49_vm0, %v680_v8, 0.0 }
 0x194   :  { %v695_v17 = vsel %vm49_vm0, %v681_v9, 0.0 }
 0x195   :  { %v690_v14 = vadd.f32 %v689_v4, %v688_v7 }
 0x197   :  { %v692_v11 = vadd.f32 %v691_v10, %v690_v14 }
 0x199   :  { %v694_v5 = vadd.f32 %v693_v15, %v692_v11 }
 0x19b   :  { %v696_v18 = vadd.f32 %v695_v17, %v694_v5 }
 0x19d   :  { %v697_v27 = vadd.f32 1e-08, %v696_v18 }
 0x19f   :  { %816 = vrcp.f32 %v697_v27 }
 0x1a9   :  { %v817_v19 = vpop.eup %816 }
 0x1aa   :  { %v699_v30 = vmul.f32 %v817_v19, %v697_v27 }
 0x1ac   :  { %v700_v20 = vsub.f32 2.0, %v699_v30 }
 0x1ae   :  { %v701_v16 = vmul.f32 %v817_v19, %v700_v20 }
 0x1b0   :  { %v702_v21 = vmul.f32 %v701_v16, %v696_v18 }
 0x1b2   :  { %703 = vst.msk [vmem:[%s1106_s2] sm:$0xff] %vm49_vm0, %v702_v21 }

</bundles_post_ra>
